<compile_context>
chip_gen: v5e
topology: v5e:2x2
jax: 0.10.0
libtpu: 0.0.40
codegen_flags: <defaults>
</compile_context>

<pallas_src>
import jax
import jax.numpy as jnp
from jax.experimental import pallas as pl
from jax.experimental.pallas import tpu as pltpu


def _pos_enc_kernel(x_ref, pe_ref, o_ref):
    # x_ref / pe_ref / o_ref: (TR, C) 2-D tiles (batch dim squeezed away).
    o_ref[...] = (x_ref[...] + pe_ref[...]).astype(o_ref.dtype)


def _chip_budgets():
    """(max_block_bytes, vmem_limit_bytes) tuned per TPU generation."""
    vmem_cap = 128 * 1024 * 1024
    try:
        info = pltpu.get_tpu_info()
        vmem_cap = int(getattr(info, "vmem_capacity_bytes", vmem_cap))
    except Exception:
        pass
    if vmem_cap <= 64 * 1024 * 1024:
        # v7x-class: 64 MiB physical VMEM, ~3.2 TB/s HBM -> smaller blocks suffice.
        return 4 * 1024 * 1024, 48 * 1024 * 1024
    # v5e / v6e: 128 MiB physical VMEM -> larger blocks to sit at HBM roofline.
    return 8 * 1024 * 1024, 64 * 1024 * 1024


def positional_encoding(x: jax.Array, pos_embedding: jax.Array, *,
                        max_block_bytes: int | None = None,
                        vmem_limit_bytes: int | None = None,
                        min_pallas_bytes: int = 256 * 1024) -> jax.Array:
    """out = x + pos_embedding (broadcast over batch).

    x:             (B, S, D)
    pos_embedding: (1, S_pe, D) with S_pe >= S (extra positions ignored).
    """
    B, S, D = x.shape
    assert pos_embedding.ndim == 3 and pos_embedding.shape[0] == 1
    S_pe = pos_embedding.shape[1]
    assert pos_embedding.shape[2] == D and S_pe >= S

    out_dtype = jnp.result_type(x.dtype, pos_embedding.dtype)
    itemsize = jnp.dtype(out_dtype).itemsize

    # Tiny problems: fixed launch + per-step overhead dominates -> fused XLA add.
    if B * S * D * itemsize < min_pallas_bytes:
        return (x + pos_embedding[:, :S, :]).astype(out_dtype)

    if max_block_bytes is None or vmem_limit_bytes is None:
        mbb, vlb = _chip_budgets()
        max_block_bytes = mbb if max_block_bytes is None else max_block_bytes
        vmem_limit_bytes = vlb if vmem_limit_bytes is None else vmem_limit_bytes

    # Sublane packing granularity for the dtype (8 for f32, 16 bf16, 32 int8/fp8).
    sub = 8 * max(1, 4 // itemsize)

    # ---- choose a lane-dense 2-D layout (R rows, C lanes) per batch slice ----
    exact_d = (D % 128 == 0)
    pad_d = 0
    if exact_d:
        R, C = S, D                              # already lane-dense
        x2 = x
        pe2 = None                               # decided after TR (slice-avoidance)
    elif (S * D) % 128 == 0:
        R, C = (S * D) // 128, 128               # fold (S, D) row-major into 128 lanes
        x2 = x.reshape(B, R, C)
        pe_s = pos_embedding if S_pe == S else pos_embedding[:, :S, :]
        pe2 = pe_s.reshape(1, R, C)
    else:
        # Lane-sparse D: pad up to the next multiple of 128 so stores are unmasked.
        Dp = ((D + 127) // 128) * 128
        pad_d = Dp - D
        R, C = S, Dp
        x2 = jnp.pad(x, ((0, 0), (0, 0), (0, pad_d)))
        pe_s = pos_embedding if S_pe == S else pos_embedding[:, :S, :]
        pe2 = jnp.pad(pe_s, ((0, 0), (0, 0), (0, pad_d)))

    # ---- row tile: large (amortize ~0.35us/step) but sized so 3 blocks x 2
    #      pipeline buffers fit comfortably under the scoped VMEM budget. ----
    max_tr = max(sub, max_block_bytes // (C * itemsize))
    if R <= max_tr:
        TR = R                                   # single row-block (full-dim block ok)
    else:
        TR = max(sub, (max_tr // sub) * sub)     # multiple of sublane packing

    if exact_d:
        # Avoid materializing pos_embedding[:, :S, :] (a separate HBM copy) when
        # the grid can safely address the first S rows of the full parameter:
        # either shapes already match, or the block's row extent is sublane-aligned.
        if S_pe == S or TR % sub == 0:
            pe2 = pos_embedding
        else:
            pe2 = pos_embedding[:, :S, :]

    # Grid: row-tile axis OUTERMOST, batch INNERMOST -> the PE block index is
    # unchanged across consecutive steps (b varies, r fixed) so its DMA is elided;
    # the larger row axis also leads for megacore sharding on v7x.
    grid = (pl.cdiv(R, TR), B)
    block = (pl.Squeezed(), TR, C)               # kernel sees plain (TR, C) tiles

    out2 = pl.pallas_call(
        _pos_enc_kernel,
        out_shape=jax.ShapeDtypeStruct((B, R, C), out_dtype),
        grid_spec=pltpu.PrefetchScalarGridSpec(
            num_scalar_prefetch=0,
            grid=grid,
            in_specs=[
                pl.BlockSpec(block, lambda r, b: (b, r, 0)),  # per-batch x tile
                pl.BlockSpec(block, lambda r, b: (0, r, 0)),  # shared PE (DMA elided over b)
            ],
            out_specs=pl.BlockSpec(block, lambda r, b: (b, r, 0)),
        ),
        compiler_params=pltpu.CompilerParams(
            dimension_semantics=("parallel", "parallel"),
            vmem_limit_bytes=vmem_limit_bytes,
        ),
    )(x2, pe2)

    if not exact_d and pad_d == 0:
        return out2.reshape(B, S, D)             # folded layout -> unfold
    if pad_d:
        return out2[:, :, :D]                    # padded layout -> strip padding
    return out2                                  # already (B, S, D)


def make_positional_encoding_params(key, d_model, max_len=1024, combined=False,
                                    dtype=jnp.float32):
    """Deterministic stand-in for nn.Parameter(torch.randn(1, max_len, d_model))."""
    view_pe = jax.random.normal(key, (1, max_len, d_model), dtype=dtype)
    if combined:
        # torch.cat([view_pe, view_pe], dim=1) -> (1, 2*max_len, d_model)
        return jnp.concatenate([view_pe, view_pe], axis=1)
    return view_pe


if __name__ == "__main__":
    key = jax.random.PRNGKey(0)

    # (B, S, D, combined, max_block_bytes, min_pallas_bytes)
    # min_pallas_bytes=0 forces the Pallas path even at these small demo shapes.
    cases = [
        (2, 8, 32, False, None, 0),          # D<128, S*D%128==0 -> lane-folded layout
        (2, 64, 128, True, 16 * 1024, 0),     # D%128==0, combined PE (S_pe>S), multi row-tile
        (2, 8, 36, False, None, 0),          # lane-sparse D -> padded-to-128 layout
        (2, 8, 32, False, None, 256 * 1024),  # tiny-problem bypass path (no kernel)
    ]
    for i, (B, S, D, combined, mbb, mpb) in enumerate(cases):
        k_pe, k_x = jax.random.split(jax.random.fold_in(key, i))
        pos_embedding = make_positional_encoding_params(
            k_pe, d_model=D, max_len=S, combined=combined)
        x = jax.random.normal(k_x, (B, S, D), dtype=jnp.float32)

        out = positional_encoding(x, pos_embedding,
                                  max_block_bytes=mbb, min_pallas_bytes=mpb)
        out = jax.block_until_ready(out)

        ref = x + pos_embedding[:, :S, :]
        assert out.shape == (B, S, D), f"shape mismatch (case {i})"
        assert jnp.allclose(out, ref, atol=1e-6, rtol=1e-6), f"mismatch vs reference (case {i})"

    print("KERNEL_OK")
</pallas_src>

<mosaic_0001>
module attributes {stable_mosaic.version = 11 : i64} {
  func.func @_pos_enc_kernel(%arg0: i32, %arg1: i32, %arg2: memref<1x2x128xf32, #tpu.memory_space<vmem>>, %arg3: memref<1x2x128xf32, #tpu.memory_space<vmem>>, %arg4: memref<1x2x128xf32, #tpu.memory_space<vmem>>) attributes {dimension_semantics = [#tpu.dimension_semantics<parallel>, #tpu.dimension_semantics<parallel>], iteration_bounds = array<i64: 1, 2>, scalar_prefetch = 0 : i64, scratch_operands = 0 : i64, tpu.core_type = #tpu.core_type<tc>, window_params = [{transform_indices = @transform_0, window_bounds = array<i64: 1, 2, 128>}, {transform_indices = @transform_1, window_bounds = array<i64: 1, 2, 128>}, {transform_indices = @transform_2, window_bounds = array<i64: 1, 2, 128>}]} {
    %c0 = arith.constant 0 : index
    %c0_0 = arith.constant 0 : index
    %c0_1 = arith.constant 0 : index
    %0 = vector.load %arg2[%c0, %c0_0, %c0_1] : memref<1x2x128xf32, #tpu.memory_space<vmem>>, vector<1x2x128xf32>
    %1 = vector.shape_cast %0 : vector<1x2x128xf32> to vector<2x128xf32>
    %c0_2 = arith.constant 0 : index
    %c0_3 = arith.constant 0 : index
    %c0_4 = arith.constant 0 : index
    %2 = vector.load %arg3[%c0_2, %c0_3, %c0_4] : memref<1x2x128xf32, #tpu.memory_space<vmem>>, vector<1x2x128xf32>
    %3 = vector.shape_cast %2 : vector<1x2x128xf32> to vector<2x128xf32>
    %4 = arith.addf %1, %3 : vector<2x128xf32>
    %c0_5 = arith.constant 0 : index
    %c0_6 = arith.constant 0 : index
    %c0_7 = arith.constant 0 : index
    %5 = vector.load %arg4[%c0_5, %c0_6, %c0_7] : memref<1x2x128xf32, #tpu.memory_space<vmem>>, vector<1x2x128xf32>
    %6 = vector.shape_cast %5 : vector<1x2x128xf32> to vector<2x128xf32>
    %7 = vector.shape_cast %4 : vector<2x128xf32> to vector<1x2x128xf32>
    tpu.vector_store %arg4[%c0_5, %c0_6, %c0_7], %7 {strides = array<i32>} : memref<1x2x128xf32, #tpu.memory_space<vmem>>, vector<1x2x128xf32>,
    return
  }
  func.func @transform_0(%arg0: i32, %arg1: i32) -> (i32, i32, i32) {
    %c0_i32 = arith.constant 0 : i32
    %c0_i32_0 = arith.constant 0 : i32
    return %arg1, %arg0, %c0_i32 : i32, i32, i32
  }
  func.func @transform_1(%arg0: i32, %arg1: i32) -> (i32, i32, i32) {
    %c0_i32 = arith.constant 0 : i32
    %c0_i32_0 = arith.constant 0 : i32
    %c0_i32_1 = arith.constant 0 : i32
    return %c0_i32, %arg0, %c0_i32_0 : i32, i32, i32
  }
  func.func @transform_2(%arg0: i32, %arg1: i32) -> (i32, i32, i32) {
    %c0_i32 = arith.constant 0 : i32
    %c0_i32_0 = arith.constant 0 : i32
    return %arg1, %arg0, %c0_i32 : i32, i32, i32
  }
}

</mosaic_0001>

<bundles_post_ra>
// kernel: tpu_custom_call.1
= control target key start
LH: loop header
LB: loop body
LE: loop exit
PB: predicated region body
PF: predicated region fallthrough
CT: control target
= control target key end

     0   :  { %7 = vsyncpa [#allocation3], 0  ;;  %s714_s0 = inlined_call_operand.hbm [shape: f32[2,2,128], index: 0, kind: input, shape index: {}]   ;;  %s715_s1 = inlined_call_operand.hbm [shape: f32[1,2,128], index: 1, kind: input, shape index: {}]   ;;  %s716_s2 = inlined_call_operand.hbm [shape: f32[2,2,128], index: 2, kind: output, shape index: {}]  }
   0x1   :  { %9 = vsyncpa [#allocation3 + $0x1], 0 }
   0x2   :  { %10 = vsyncpa [#allocation6], 0 }
   0x3   :  { %11 = vsyncpa [#allocation4], 0 }
   0x4   :  { %13 = vsyncpa [#allocation4 + $0x1], 0  ;;  %s565_s9 = smov 0   ;;  %s567_s10 = smov 0  }
   0x5   :  { %s569_s11 = smov 0   ;;  %s571_s12 = smov 0  }
   0x6   :  { %s573_s13 = smov 0   ;;  %s575_s14 = smov 0  }
   0x7 LB: > { %s313_s15 = sadd.s32 4294967295, %s547_s14   ;;  %s314_s16 = sadd.s32 4294967294, %s547_s14   ;;  %s547_s14 = sphi %s575_s14, %s19_s14   ;;  %s543_s13 = sphi %s573_s13, %s728_s13   ;;  %s539_s12 = sphi %s571_s12, %s727_s12   ;;  %s535_s11 = sphi %s569_s11, %s726_s11   ;;  %s531_s10 = sphi %s567_s10, %s725_s10   ;;  %s527_s9 = sphi %s565_s9, %s724_s9  }
   0x8   : > { %p53_p0 = scmp.ne.s32.totalorder %s531_s10, %s527_s9  ;;  %p599_p1 = scmp.eq.s32.totalorder %s313_s15, 0 }
   0x9   : > { %p603_p2 = scmp.eq.s32.totalorder %s313_s15, 1  ;;  %p111_p3 = scmp.eq.s32.totalorder %s314_s16, 1 }
   0xa   : > { %p609_p4 = por %p599_p1, %p53_p0  ;;  %p315_p5 = scmp.ge.s32.totalorder %s547_s14, 1 }
   0xb   : > { %p614_p6 = por %p111_p3, %p53_p0  ;;  %p118_p7 = scmp.lt.s32.totalorder %s547_s14, 3 }
   0xc   : > { %s132_s23 = sshll.u32 %s715_s1, 4  ;;  %p317_p9 = scmp.ge.s32.totalorder %s547_s14, 2  ;;  %s133_s23 = int_to_ptr.hbm [resolvable:$true] %s132_s23 }
   0xd   : > { %p622_p8 = pnand %p315_p5, %p118_p7  ;;  %s549_s25 = smov [#allocation5]  }
   0xe   : > { %s134_s26 = sshll.u32 %s549_s25, 4  ;;  %s28_s27 = sadd.s32 1, %s543_s13  ;;  %s135_s26 = int_to_ptr.vmem [resolvable:$true] %s134_s26 }
   0xf   : > { %p336_p10 = pneg %p622_p8  ;;  %p29_p12 = scmp.ge.s32.totalorder %s28_s27, 2 }
  0x10   : > { %s40_s28 = sadd.s32 1, %s535_s11  ;;  %p47_p13 = scmp.ne.s32.totalorder %s535_s11, %s531_s10 }
  0x11   : > { %p337_p11 = pnand %p336_p10, %p599_p1  ;;  %p48_p0 = scmp.eq.s32.totalorder %s547_s14, 0 }
  0x12   : > { %s730_s27 = smov (%p29_p12, %s28_s27), 0  ;;  %p644_p5 = por %p603_p2, %p47_p13 }
  0x13   : > { %339 = dma.hbm_to_vmem [thread:$0]  (!%p337_p11), %s133_s23, 32, %s135_s26, [#allocation6]  }
  0x14   : > { %p638_p3 = por %p48_p0, %p47_p13  ;;  %s35_s3 = ssub.s32 %s543_s13, %s730_s27 }
  0x15   : > { %p349_p7 = scmp.lt.s32.totalorder %s547_s14, 2  ;;  %p38_p10 = scmp.eq.s32.totalorder %s35_s3, 0 }
  0x16   : > { %s145_s4 = sand.u32 1, %s535_s11   ;;  %s319_s7 = sshll.u32 %s543_s13, 1 }
  0x17   : > { %s318_s5 = sshll.u32 %s145_s4, 1  ;;  %s154_s16 = scalar_lea.hbm %s714_s0, %s319_s7 }
  0x18   : > { %s653_s6 = scalar_select %p38_p10, %s535_s11, %s40_s28  }
  0x19   : > { %s149_s21 = scalar_lea.vmem [#allocation2], %s318_s5  ;;  %s156_s18 = sshll.u32 %s154_s16, 4  ;;  %s157_s18 = int_to_ptr.hbm [resolvable:$true] %s156_s18 }
  0x1a   : > { %s158_s22 = sshll.u32 %s149_s21, 4  ;;  %p341_p2 = pnand %p349_p7, %p638_p3  ;;  %s159_s22 = int_to_ptr.vmem [resolvable:$true] %s158_s22 }
  0x1b   : > { %s146_s23 = scalar_lea.sflag [#allocation3], %s145_s4  ;;  %167 = sbr.rel (%p622_p8) target bundleno = 50 (0x32), region = 28 }
  0x1c   : > { %343 = dma.hbm_to_vmem [thread:$0]  (!%p341_p2), %s157_s18, 32, %s159_s22, %s146_s23  }
  0x1d   : > { %s664_s25 = sand.u32 (!%p622_p8), 1, %s531_s10  }
  0x1e   : > { %s321_s26 = sshll.u32 (!%p622_p8), %s664_s25, 1  ;;  %s170_s28 = scalar_lea.sflag (!%p622_p8), [#allocation3], %s664_s25 }
  0x1f   : > { %s173_s3 = scalar_lea.vmem (!%p622_p8), [#allocation2], %s321_s26 }
  0x20   : > { %514 = dma.done.wait (%p609_p4), %s170_s28, 32  }
  0x21   : > { %516 = vsyncadd (%p609_p4), %s170_s28, 4294967264 }
  0x22   : > { %518 = dma.done.wait (%p599_p1), [#allocation6], 32  }
  0x23   : > { %520 = vsyncadd (%p599_p1), [#allocation6], 4294967264  ;;  %s325_s24 = sshll.u32 %s539_s12, 1  ;;  %s199_s7 = scalar_lea.vmem [#allocation7], %s321_s26  ;;  %v200_v0 = vld [vmem:[%s173_s3] sm:$0x3] }
  0x24   : > { %s216_s5 = scalar_lea.hbm %s716_s2, %s325_s24  ;;  %s218_s8 = sshll.u32 %s199_s7, 4  ;;  %v201_v1 = vld [vmem:[#allocation5] sm:$0x3]  ;;  %s219_s8 = int_to_ptr.vmem [resolvable:$true] %s218_s8 }
  0x25   : > { %s220_s15 = sshll.u32 %s216_s5, 4  ;;  %v202_v2 = vadd.f32 %v201_v1, %v200_v0  ;;  %s205_s19 = scalar_lea.sflag [#allocation4], %s664_s25  ;;  %s221_s15 = int_to_ptr.hbm [resolvable:$true] %s220_s15 }
  0x26   : > { %s475_s17 = sshra.s32 %s221_s15, 4  ;;  %s481_s22 = scalar_lea.hbm %s716_s2, 4  ;;  %s476_s17 = int_to_ptr.hbm [resolvable:$true] %s475_s17 }
  0x27   : > { %203 = vst [vmem:[%s199_s7] sm:$0x3] %v202_v2  ;;  %s477_s16 = scalar_lea.hbm %s476_s17, 2  ;;  %p482_p11 = scmp.lt.s32.totalorder %s476_s17, %s716_s2 }
  0x28   : > { %p478_p1 = scmp.ne.s32.totalorder %s476_s17, %s477_s16  ;;  %p483_p12 = scmp.lt.s32.totalorder %s481_s22, %s477_s16 }
  0x2a   : > { %p479_p4 = pnand %p478_p1, %p644_p5  ;;  %p484_p13 = por %p483_p12, %p482_p11 }
  0x2c   : > { %p480_p8 = pneg %p479_p4 }
  0x2e   : > { %p485_p0 = pnand %p484_p13, %p480_p8 }
  0x30   : > { %488 = shalt.err (!%p485_p0)
}
  0x31   : > { %334 = dma.vmem_to_hbm [thread:$0]  (%p644_p5), %s219_s8, 32, %s221_s15, %s205_s19  }
  0x32 PF: > { %s232_s25 = sand.u32 1, %s527_s9   ;;  %p345_p3 = pnand %p317_p9, %p614_p6 }
  0x33   : > { %s233_s26 = scalar_lea.sflag [#allocation4], %s232_s25 }
  0x34   : > { %p346_p7 = pneg %p345_p3 }
  0x36   : > { %522 = dma.done.wait (%p346_p7), %s233_s26, 32  }
  0x37   : > { %524 = vsyncadd (%p346_p7), %s233_s26, 4294967264  ;;  %s19_s14 = sadd.s32 1, %s547_s14   ;;  %s724_s9 = smov %s531_s10 }
  0x38   : > { %p16_p10 = scmp.ge.s32.totalorder %s19_s14, 4   ;;  %s725_s10 = smov %s535_s11 }
  0x39   : > { %s726_s11 = smov %s653_s6  ;;  %s727_s12 = smov %s543_s13 }
  0x3a   : > { %s728_s13 = smov %s730_s27  ;;  %18 = sbr.rel (!%p16_p10) target bundleno = 7 (0x7), region = 78 }
  0x3f   :  { %239 = vsyncpa [#allocation3], 1 }
  0x40   :  { %241 = vsyncpa [#allocation3 + $0x1], 1 }
  0x41   :  { %242 = vsyncpa [#allocation6], 1 }
  0x42   :  { %243 = vsyncpa [#allocation4], 1 }
  0x43   :  { %245 = vsyncpa [#allocation4 + $0x1], 1 }

</bundles_post_ra>
